<compile_context>
chip_gen: v7x
topology: tpu7x:2x2x1
jax: 0.10.0
libtpu: 0.0.40
codegen_flags: <defaults>
</compile_context>

<pallas_src>
import jax
import jax.numpy as jnp
from jax.experimental import pallas as pl
from jax.experimental.pallas import tpu as pltpu

# ----------------------------------------------------------------------------
# Problem setup (mirrors the PyTorch script)
# ----------------------------------------------------------------------------
raw_text = (
    'We are about to study the idea of a computational process.\n'
    'Computational processes are abstract beings that inhabit computers.\n'
    'As they evolve, processes manipulate other abstract things called data.\n'
    'The evolution of a process is directed by a pattern of rules\n'
    'called a program. People create programs to direct processes. In effect,\n'
    'we conjure the spirits of the computer with our spells.'
).split()

vocab = sorted(set(raw_text))           # sorted -> deterministic ordering
VOCAB_SIZE = len(vocab)
EMBEDDING_DIM = 10
CONTEXT_SIZE = 2                        # CBOW window: 2 words each side
N_CTX = 2 * CONTEXT_SIZE                # 4 context words per example
IN_DIM = EMBEDDING_DIM * N_CTX          # 40
HIDDEN = 128

# Lane/sublane-friendly padded sizes
VOCAB_PAD = 128                         # next multiple of 128 >= VOCAB_SIZE
E_PAD = 32                              # padded embedding dim
IN_DIM_PAD = E_PAD * N_CTX              # 128
B_TILE = 8                              # f32 sublane multiple; batch tile


# ----------------------------------------------------------------------------
# Pallas kernel: one-hot gather -> linear1 -> relu -> linear2 -> log_softmax
# ----------------------------------------------------------------------------
def cbow_kernel(idx_ref, emb_ref, w1_ref, b1_ref, w2_ref, b2_ref, o_ref):
    # idx_ref: (B_TILE, N_CTX) int32         emb_ref: (VOCAB_PAD, E_PAD) f32
    # w1_ref : (IN_DIM_PAD, HIDDEN) f32      b1_ref : (1, HIDDEN) f32
    # w2_ref : (HIDDEN, VOCAB_PAD) f32       b2_ref : (1, VOCAB_PAD) f32
    # o_ref  : (B_TILE, VOCAB_PAD) f32
    idx = idx_ref[...]                                              # (B, N_CTX)
    vocab_iota = jax.lax.broadcasted_iota(jnp.int32, (B_TILE, VOCAB_PAD), 1)

    emb = emb_ref[...]
    h = jnp.zeros((B_TILE, HIDDEN), jnp.float32)
    for k in range(N_CTX):  # static, tiny loop (4 context slots)
        # One-hot gather on the MXU: rows of emb selected by idx[:, k].
        onehot_k = (idx[:, k:k + 1] == vocab_iota).astype(jnp.float32)
        e_k = jnp.dot(onehot_k, emb, preferred_element_type=jnp.float32)
        # Partial contribution of this slot's flattened features to linear1.
        h = h + jnp.dot(e_k, w1_ref[k * E_PAD:(k + 1) * E_PAD, :],
                        preferred_element_type=jnp.float32)

    h = jnp.maximum(h + b1_ref[...], 0.0)                           # F.relu
    logits = jnp.dot(h, w2_ref[...], preferred_element_type=jnp.float32)
    logits = logits + b2_ref[...]

    # Mask padded vocab lanes so they cannot affect the log_softmax normalizer.
    logits = jnp.where(vocab_iota < VOCAB_SIZE, logits, jnp.float32(-1e30))

    m = jnp.max(logits, axis=-1, keepdims=True)
    shifted = logits - m
    lse = jnp.log(jnp.sum(jnp.exp(shifted), axis=-1, keepdims=True))
    o_ref[...] = shifted - lse


def cbow_forward_padded(idx_pad, emb_p, w1_p, b1, w2_p, b2_p):
    """idx_pad: (B_pad, N_CTX) int32, B_pad % B_TILE == 0.
    Returns (B_pad, VOCAB_PAD) log-probs (padded lanes are garbage)."""
    b_pad = idx_pad.shape[0]
    return pl.pallas_call(
        cbow_kernel,
        out_shape=jax.ShapeDtypeStruct((b_pad, VOCAB_PAD), jnp.float32),
        grid_spec=pltpu.PrefetchScalarGridSpec(
            num_scalar_prefetch=0,
            grid=(b_pad // B_TILE,),
            in_specs=[
                pl.BlockSpec((B_TILE, N_CTX), lambda i: (i, 0)),
                pl.BlockSpec((VOCAB_PAD, E_PAD), lambda i: (0, 0)),
                pl.BlockSpec((IN_DIM_PAD, HIDDEN), lambda i: (0, 0)),
                pl.BlockSpec((1, HIDDEN), lambda i: (0, 0)),
                pl.BlockSpec((HIDDEN, VOCAB_PAD), lambda i: (0, 0)),
                pl.BlockSpec((1, VOCAB_PAD), lambda i: (0, 0)),
            ],
            out_specs=pl.BlockSpec((B_TILE, VOCAB_PAD), lambda i: (i, 0)),
        ),
        compiler_params=pltpu.CompilerParams(
            dimension_semantics=("parallel",)),  # batch tiles shard across TCs
    )(idx_pad, emb_p, w1_p, b1, w2_p, b2_p)


# ----------------------------------------------------------------------------
# Parameter init (deterministic, nn.Linear-equivalent layout) + padding
# ----------------------------------------------------------------------------
def init_params(key):
    k_emb, k_w1, k_b1, k_w2, k_b2 = jax.random.split(key, 5)
    emb = jax.random.normal(k_emb, (VOCAB_SIZE, EMBEDDING_DIM), jnp.float32)
    lim1 = 1.0 / jnp.sqrt(IN_DIM)
    w1 = jax.random.uniform(k_w1, (IN_DIM, HIDDEN), jnp.float32, -lim1, lim1)
    b1 = jax.random.uniform(k_b1, (1, HIDDEN), jnp.float32, -lim1, lim1)
    lim2 = 1.0 / jnp.sqrt(HIDDEN)
    w2 = jax.random.uniform(k_w2, (HIDDEN, VOCAB_SIZE), jnp.float32, -lim2, lim2)
    b2 = jax.random.uniform(k_b2, (1, VOCAB_SIZE), jnp.float32, -lim2, lim2)
    return emb, w1, b1, w2, b2


def pad_params(params):
    """One-time padding of weights to lane-dense shapes (zeros in padding)."""
    emb, w1, b1, w2, b2 = params
    emb_p = (jnp.zeros((VOCAB_PAD, E_PAD), jnp.float32)
             .at[:VOCAB_SIZE, :EMBEDDING_DIM].set(emb))
    # Re-lay w1 rows so row (k*E_PAD + d) matches slot k, padded emb dim d.
    w1_p = (jnp.zeros((N_CTX, E_PAD, HIDDEN), jnp.float32)
            .at[:, :EMBEDDING_DIM, :].set(w1.reshape(N_CTX, EMBEDDING_DIM, HIDDEN))
            .reshape(IN_DIM_PAD, HIDDEN))
    w2_p = jnp.zeros((HIDDEN, VOCAB_PAD), jnp.float32).at[:, :VOCAB_SIZE].set(w2)
    b2_p = jnp.zeros((1, VOCAB_PAD), jnp.float32).at[:, :VOCAB_SIZE].set(b2)
    return emb_p, w1_p, b1, w2_p, b2_p


def cbow_apply(padded_params, inputs):
    """inputs: (N_CTX,) single window -> (1, VOCAB_SIZE) log-probs (matches
    the PyTorch module), or (B, N_CTX) batch -> (B, VOCAB_SIZE)."""
    single = inputs.ndim == 1
    idx = inputs.reshape(1, -1) if single else inputs
    b = idx.shape[0]
    b_pad = ((b + B_TILE - 1) // B_TILE) * B_TILE
    idx_pad = jnp.zeros((b_pad, N_CTX), jnp.int32).at[:b].set(idx.astype(jnp.int32))
    out = cbow_forward_padded(idx_pad, *padded_params)
    return out[:b, :VOCAB_SIZE]


def cbow_reference(params, inputs):
    """Pure-JAX reference for correctness checking."""
    emb, w1, b1, w2, b2 = params
    idx = inputs.reshape(1, -1) if inputs.ndim == 1 else inputs
    x = jnp.take(emb, idx, axis=0).reshape(idx.shape[0], -1)
    h = jnp.maximum(x @ w1 + b1, 0.0)
    logits = h @ w2 + b2
    return jax.nn.log_softmax(logits, axis=-1)


if __name__ == "__main__":
    key = jax.random.PRNGKey(0)
    params = init_params(key)
    padded_params = pad_params(params)

    # Batch of 16 context windows (2 parallel grid tiles of 8).
    B = 16
    inputs = jax.random.randint(
        jax.random.PRNGKey(0), (B, N_CTX), 0, VOCAB_SIZE, jnp.int32)

    log_probs = cbow_apply(padded_params, inputs)
    jax.block_until_ready(log_probs)
    ref = cbow_reference(params, inputs)
    assert log_probs.shape == (B, VOCAB_SIZE)
    assert jnp.allclose(log_probs, ref, atol=1e-5, rtol=1e-5)

    # Original module semantics: a single context window -> (1, vocab_size).
    single = inputs[0]
    lp1 = cbow_apply(padded_params, single)
    jax.block_until_ready(lp1)
    assert lp1.shape == (1, VOCAB_SIZE)
    assert jnp.allclose(lp1, cbow_reference(params, single), atol=1e-5, rtol=1e-5)

    print("KERNEL_OK")
</pallas_src>

<mosaic_0001>
module attributes {stable_mosaic.version = 11 : i64} {
  func.func @cbow_kernel(%arg0: i32, %arg1: memref<8x4xi32, #tpu.memory_space<vmem>>, %arg2: memref<128x32xf32, #tpu.memory_space<vmem>>, %arg3: memref<128x128xf32, #tpu.memory_space<vmem>>, %arg4: memref<1x128xf32, #tpu.memory_space<vmem>>, %arg5: memref<128x128xf32, #tpu.memory_space<vmem>>, %arg6: memref<1x128xf32, #tpu.memory_space<vmem>>, %arg7: memref<8x128xf32, #tpu.memory_space<vmem>>) attributes {dimension_semantics = [#tpu.dimension_semantics<parallel>], iteration_bounds = array<i64: 2>, scalar_prefetch = 0 : i64, scratch_operands = 0 : i64, tpu.core_type = #tpu.core_type<tc>, window_params = [{transform_indices = @transform_0, window_bounds = array<i64: 8, 4>}, {pipeline_mode = #tpu.pipeline_mode<synchronous>, transform_indices = @transform_1, window_bounds = array<i64: 128, 32>}, {pipeline_mode = #tpu.pipeline_mode<synchronous>, transform_indices = @transform_2, window_bounds = array<i64: 128, 128>}, {pipeline_mode = #tpu.pipeline_mode<synchronous>, transform_indices = @transform_3, window_bounds = array<i64: 1, 128>}, {pipeline_mode = #tpu.pipeline_mode<synchronous>, transform_indices = @transform_4, window_bounds = array<i64: 128, 128>}, {pipeline_mode = #tpu.pipeline_mode<synchronous>, transform_indices = @transform_5, window_bounds = array<i64: 1, 128>}, {transform_indices = @transform_6, window_bounds = array<i64: 8, 128>}]} {
    %c0 = arith.constant 0 : index
    %c0_0 = arith.constant 0 : index
    %0 = vector.load %arg1[%c0, %c0_0] : memref<8x4xi32, #tpu.memory_space<vmem>>, vector<8x4xi32>
    %1 = tpu.iota {dimensions = array<i32: 1>} : vector<8x128xi32>
    %c0_1 = arith.constant 0 : index
    %c0_2 = arith.constant 0 : index
    %2 = vector.load %arg2[%c0_1, %c0_2] : memref<128x32xf32, #tpu.memory_space<vmem>>, vector<128x32xf32>
    %cst = arith.constant 0.000000e+00 : f32
    %3 = vector.broadcast %cst : f32 to vector<8x128xf32>
    %4 = vector.extract_strided_slice %0 {offsets = [0, 0], sizes = [8, 1], strides = [1, 1]} : vector<8x4xi32> to vector<8x1xi32>
    %5 = vector.broadcast %4 : vector<8x1xi32> to vector<8x128xi32>
    %6 = arith.cmpi eq, %5, %1 : vector<8x128xi32>
    %7 = arith.extui %6 : vector<8x128xi1> to vector<8x128xi32>
    %8 = arith.sitofp %7 : vector<8x128xi32> to vector<8x128xf32>
    %cst_3 = arith.constant dense<0.000000e+00> : vector<8x32xf32>
    %9 = tpu.matmul %8, %2, %cst_3 {dimension_numbers = #tpu.dot_dimension_numbers<[1], [0], [0], [1], [0, 0, 1, 1], [], []>} : vector<8x128xf32>, vector<128x32xf32>, vector<8x32xf32> -> vector<8x32xf32>
    %c0_4 = arith.constant 0 : index
    %c0_5 = arith.constant 0 : index
    %10 = vector.load %arg3[%c0_4, %c0_5] : memref<128x128xf32, #tpu.memory_space<vmem>>, vector<32x128xf32>
    %cst_6 = arith.constant dense<0.000000e+00> : vector<8x128xf32>
    %11 = tpu.matmul %9, %10, %cst_6 {dimension_numbers = #tpu.dot_dimension_numbers<[1], [0], [0], [1], [0, 0, 1, 1], [], []>} : vector<8x32xf32>, vector<32x128xf32>, vector<8x128xf32> -> vector<8x128xf32>
    %12 = arith.addf %3, %11 : vector<8x128xf32>
    %13 = vector.extract_strided_slice %0 {offsets = [0, 1], sizes = [8, 1], strides = [1, 1]} : vector<8x4xi32> to vector<8x1xi32>
    %14 = vector.broadcast %13 : vector<8x1xi32> to vector<8x128xi32>
    %15 = arith.cmpi eq, %14, %1 : vector<8x128xi32>
    %16 = arith.extui %15 : vector<8x128xi1> to vector<8x128xi32>
    %17 = arith.sitofp %16 : vector<8x128xi32> to vector<8x128xf32>
    %cst_7 = arith.constant dense<0.000000e+00> : vector<8x32xf32>
    %18 = tpu.matmul %17, %2, %cst_7 {dimension_numbers = #tpu.dot_dimension_numbers<[1], [0], [0], [1], [0, 0, 1, 1], [], []>} : vector<8x128xf32>, vector<128x32xf32>, vector<8x32xf32> -> vector<8x32xf32>
    %c32 = arith.constant 32 : index
    %c0_8 = arith.constant 0 : index
    %19 = vector.load %arg3[%c32, %c0_8] : memref<128x128xf32, #tpu.memory_space<vmem>>, vector<32x128xf32>
    %cst_9 = arith.constant dense<0.000000e+00> : vector<8x128xf32>
    %20 = tpu.matmul %18, %19, %cst_9 {dimension_numbers = #tpu.dot_dimension_numbers<[1], [0], [0], [1], [0, 0, 1, 1], [], []>} : vector<8x32xf32>, vector<32x128xf32>, vector<8x128xf32> -> vector<8x128xf32>
    %21 = arith.addf %12, %20 : vector<8x128xf32>
    %22 = vector.extract_strided_slice %0 {offsets = [0, 2], sizes = [8, 1], strides = [1, 1]} : vector<8x4xi32> to vector<8x1xi32>
    %23 = vector.broadcast %22 : vector<8x1xi32> to vector<8x128xi32>
    %24 = arith.cmpi eq, %23, %1 : vector<8x128xi32>
    %25 = arith.extui %24 : vector<8x128xi1> to vector<8x128xi32>
    %26 = arith.sitofp %25 : vector<8x128xi32> to vector<8x128xf32>
    %cst_10 = arith.constant dense<0.000000e+00> : vector<8x32xf32>
    %27 = tpu.matmul %26, %2, %cst_10 {dimension_numbers = #tpu.dot_dimension_numbers<[1], [0], [0], [1], [0, 0, 1, 1], [], []>} : vector<8x128xf32>, vector<128x32xf32>, vector<8x32xf32> -> vector<8x32xf32>
    %c64 = arith.constant 64 : index
    %c0_11 = arith.constant 0 : index
    %28 = vector.load %arg3[%c64, %c0_11] : memref<128x128xf32, #tpu.memory_space<vmem>>, vector<32x128xf32>
    %cst_12 = arith.constant dense<0.000000e+00> : vector<8x128xf32>
    %29 = tpu.matmul %27, %28, %cst_12 {dimension_numbers = #tpu.dot_dimension_numbers<[1], [0], [0], [1], [0, 0, 1, 1], [], []>} : vector<8x32xf32>, vector<32x128xf32>, vector<8x128xf32> -> vector<8x128xf32>
    %30 = arith.addf %21, %29 : vector<8x128xf32>
    %31 = vector.extract_strided_slice %0 {offsets = [0, 3], sizes = [8, 1], strides = [1, 1]} : vector<8x4xi32> to vector<8x1xi32>
    %32 = vector.broadcast %31 : vector<8x1xi32> to vector<8x128xi32>
    %33 = arith.cmpi eq, %32, %1 : vector<8x128xi32>
    %34 = arith.extui %33 : vector<8x128xi1> to vector<8x128xi32>
    %35 = arith.sitofp %34 : vector<8x128xi32> to vector<8x128xf32>
    %cst_13 = arith.constant dense<0.000000e+00> : vector<8x32xf32>
    %36 = tpu.matmul %35, %2, %cst_13 {dimension_numbers = #tpu.dot_dimension_numbers<[1], [0], [0], [1], [0, 0, 1, 1], [], []>} : vector<8x128xf32>, vector<128x32xf32>, vector<8x32xf32> -> vector<8x32xf32>
    %c96 = arith.constant 96 : index
    %c0_14 = arith.constant 0 : index
    %37 = vector.load %arg3[%c96, %c0_14] : memref<128x128xf32, #tpu.memory_space<vmem>>, vector<32x128xf32>
    %cst_15 = arith.constant dense<0.000000e+00> : vector<8x128xf32>
    %38 = tpu.matmul %36, %37, %cst_15 {dimension_numbers = #tpu.dot_dimension_numbers<[1], [0], [0], [1], [0, 0, 1, 1], [], []>} : vector<8x32xf32>, vector<32x128xf32>, vector<8x128xf32> -> vector<8x128xf32>
    %39 = arith.addf %30, %38 : vector<8x128xf32>
    %c0_16 = arith.constant 0 : index
    %c0_17 = arith.constant 0 : index
    %40 = vector.load %arg4[%c0_16, %c0_17] : memref<1x128xf32, #tpu.memory_space<vmem>>, vector<1x128xf32>
    %41 = vector.broadcast %40 : vector<1x128xf32> to vector<8x128xf32>
    %42 = arith.addf %39, %41 : vector<8x128xf32>
    %cst_18 = arith.constant 0.000000e+00 : f32
    %43 = vector.broadcast %cst_18 : f32 to vector<8x128xf32>
    %44 = arith.maximumf %42, %43 : vector<8x128xf32>
    %c0_19 = arith.constant 0 : index
    %c0_20 = arith.constant 0 : index
    %45 = vector.load %arg5[%c0_19, %c0_20] : memref<128x128xf32, #tpu.memory_space<vmem>>, vector<128x128xf32>
    %cst_21 = arith.constant dense<0.000000e+00> : vector<8x128xf32>
    %46 = tpu.matmul %44, %45, %cst_21 {dimension_numbers = #tpu.dot_dimension_numbers<[1], [0], [0], [1], [0, 0, 1, 1], [], []>} : vector<8x128xf32>, vector<128x128xf32>, vector<8x128xf32> -> vector<8x128xf32>
    %c0_22 = arith.constant 0 : index
    %c0_23 = arith.constant 0 : index
    %47 = vector.load %arg6[%c0_22, %c0_23] : memref<1x128xf32, #tpu.memory_space<vmem>>, vector<1x128xf32>
    %48 = vector.broadcast %47 : vector<1x128xf32> to vector<8x128xf32>
    %49 = arith.addf %46, %48 : vector<8x128xf32>
    %c49_i32 = arith.constant 49 : i32
    %50 = vector.broadcast %c49_i32 : i32 to vector<8x128xi32>
    %51 = arith.cmpi slt, %1, %50 : vector<8x128xi32>
    %cst_24 = arith.constant -1.000000e+30 : f32
    %52 = vector.broadcast %cst_24 : f32 to vector<8x128xf32>
    %53 = arith.select %51, %49, %52 : vector<8x128xi1>, vector<8x128xf32>
    %cst_25 = arith.constant dense<0xFF800000> : vector<8xf32>
    %54 = vector.multi_reduction <maximumf>, %53, %cst_25 [1] : vector<8x128xf32> to vector<8xf32>
    %55 = vector.shape_cast %54 : vector<8xf32> to vector<8x1xf32>
    %56 = vector.broadcast %55 : vector<8x1xf32> to vector<8x128xf32>
    %57 = arith.subf %53, %56 : vector<8x128xf32>
    %58 = math.exp %57 : vector<8x128xf32>
    %cst_26 = arith.constant dense<0.000000e+00> : vector<8xf32>
    %59 = vector.multi_reduction <add>, %58, %cst_26 [1] : vector<8x128xf32> to vector<8xf32>
    %60 = vector.shape_cast %59 : vector<8xf32> to vector<8x1xf32>
    %61 = math.log %60 : vector<8x1xf32>
    %62 = vector.broadcast %61 : vector<8x1xf32> to vector<8x128xf32>
    %63 = arith.subf %57, %62 : vector<8x128xf32>
    %c0_27 = arith.constant 0 : index
    %c0_28 = arith.constant 0 : index
    %64 = vector.load %arg7[%c0_27, %c0_28] : memref<8x128xf32, #tpu.memory_space<vmem>>, vector<8x128xf32>
    tpu.vector_store %arg7[%c0_27, %c0_28], %63 {strides = array<i32>} : memref<8x128xf32, #tpu.memory_space<vmem>>, vector<8x128xf32>,
    return
  }
  func.func @transform_0(%arg0: i32) -> (i32, i32) {
    %c0_i32 = arith.constant 0 : i32
    %c0_i32_0 = arith.constant 0 : i32
    return %arg0, %c0_i32 : i32, i32
  }
  func.func @transform_1(%arg0: i32) -> (i32, i32) {
    %c0_i32 = arith.constant 0 : i32
    %c0_i32_0 = arith.constant 0 : i32
    %c0_i32_1 = arith.constant 0 : i32
    return %c0_i32, %c0_i32_0 : i32, i32
  }
  func.func @transform_2(%arg0: i32) -> (i32, i32) {
    %c0_i32 = arith.constant 0 : i32
    %c0_i32_0 = arith.constant 0 : i32
    %c0_i32_1 = arith.constant 0 : i32
    return %c0_i32, %c0_i32_0 : i32, i32
  }
  func.func @transform_3(%arg0: i32) -> (i32, i32) {
    %c0_i32 = arith.constant 0 : i32
    %c0_i32_0 = arith.constant 0 : i32
    %c0_i32_1 = arith.constant 0 : i32
    return %c0_i32, %c0_i32_0 : i32, i32
  }
  func.func @transform_4(%arg0: i32) -> (i32, i32) {
    %c0_i32 = arith.constant 0 : i32
    %c0_i32_0 = arith.constant 0 : i32
    %c0_i32_1 = arith.constant 0 : i32
    return %c0_i32, %c0_i32_0 : i32, i32
  }
  func.func @transform_5(%arg0: i32) -> (i32, i32) {
    %c0_i32 = arith.constant 0 : i32
    %c0_i32_0 = arith.constant 0 : i32
    %c0_i32_1 = arith.constant 0 : i32
    return %c0_i32, %c0_i32_0 : i32, i32
  }
  func.func @transform_6(%arg0: i32) -> (i32, i32) {
    %c0_i32 = arith.constant 0 : i32
    %c0_i32_0 = arith.constant 0 : i32
    return %arg0, %c0_i32 : i32, i32
  }
}

</mosaic_0001>

<bundles_post_ra>
// kernel: tpu_custom_call.1
= control target key start
LH: loop header
LB: loop body
LE: loop exit
PB: predicated region body
PF: predicated region fallthrough
CT: control target
= control target key end

     0   :  { %11 = vsyncpa [#allocation3], 0  ;;  %s2174_s0 = inlined_call_operand.vmem [shape: s32[16,4], index: 0, kind: input, shape index: {}]   ;;  %s2175_s1 = inlined_call_operand.vmem [shape: f32[128,32], index: 1, kind: input, shape index: {}]   ;;  %s2176_s2 = inlined_call_operand.vmem [shape: f32[128,128], index: 2, kind: input, shape index: {}]   ;;  %s2177_s3 = inlined_call_operand.vmem [shape: f32[1,128], index: 3, kind: input, shape index: {}]   ;;  %s2178_s4 = inlined_call_operand.hbm [shape: f32[128,128], index: 4, kind: input, shape index: {}]   ;;  %s2179_s5 = inlined_call_operand.vmem [shape: f32[1,128], index: 5, kind: input, shape index: {}]   ;;  %s2180_s6 = inlined_call_operand.hbm [shape: f32[16,128], index: 6, kind: output, shape index: {}]  }
   0x1   :  { %12 = vsyncpa [#allocation4], 0 }
   0x2   :  { %14 = vsyncpa [#allocation4 + $0x1], 0  ;;  %s1802_s21 = smov 0   ;;  %s1804_s22 = smov 0  }
   0x3   :  { %s1806_s23 = smov 0   ;;  %s1808_s24 = smov 0  }
   0x4 LB: > { %s1823_s25 = sadd.s32 4294967295, %s1753_s24   ;;  %s1096_s26 = sadd.s32 4294967294, %s1753_s24   ;;  %s1753_s24 = sphi %s1808_s24, %s2196_s24   ;;  %s1749_s23 = sphi %s1806_s23, %s2195_s23   ;;  %s1745_s22 = sphi %s1804_s22, %s2194_s22   ;;  %s1741_s21 = sphi %s1802_s21, %s2193_s21  }
   0x5   : > { %s1827_s27 = sadd.s32 1, %s1753_s24   ;;  %s158_s28 = sadd.s32 1, %s1749_s23 }
   0x6   : > { %s155_s29 = ssub.s32 %s1753_s24, %s1827_s27  ;;  %p168_p0 = scmp.ne.s32.totalorder %s1749_s23, %s1745_s22 }
   0x7   : > { %p156_p1 = scmp.eq.s32.totalorder %s155_s29, 0  ;;  %p169_p2 = scmp.eq.s32.totalorder %s1823_s25, 1 }
   0x8   : > { %p174_p3 = scmp.ne.s32.totalorder %s1745_s22, %s1741_s21  ;;  %p175_p4 = scmp.eq.s32.totalorder %s1096_s26, 1 }
   0x9   : > { %s1838_s30 = scalar_select %p156_p1, %s1749_s23, %s158_s28  }
   0xa   : > { %p1840_p5 = por %p169_p2, %p168_p0  ;;  %p1844_p6 = por %p175_p4, %p174_p3 }
   0xb   : > { %p1097_p7 = scmp.ge.s32.totalorder %s1753_s24, 1  ;;  %p182_p8 = scmp.lt.s32.totalorder %s1753_s24, 3 }
   0xc   : > { %s2184_s7 = scalar_select %p1840_p5, 1, 0 }
   0xd   : > { %s2185_s8 = scalar_select %p1844_p6, 1, 0 }
   0xe   : > { %p2181_p9 = scmp.eq.s32.totalorder %s1823_s25, 0  ;;  %p1851_p10 = pnand %p1097_p7, %p182_p8 }
   0xf   : > { %s1755_s10 = smov [#allocation2]   ;;  %s1659_s15 = scalar_lea.hbm %s2178_s4, 2048 }
  0x10   : > { %s2186_s9 = scalar_select %p1851_p10, 1, 0 }
  0x11   : > { %s203_s11 = sshll.u32 %s1755_s10, 4  ;;  %p1596_p11 = pneg %p1851_p10  ;;  %s204_s11 = int_to_ptr.vmem [resolvable:$true] %s203_s11 }
  0x12   : > { %p1660_p13 = scmp.ne.s32.totalorder %s2178_s4, %s1659_s15  ;;  %p1666_p3 = scmp.lt.u32.totalorder %s1659_s15, %s2178_s4 }
  0x13   : > { %p1859_p12 = pnand %p2181_p9, %p1596_p11 }
  0x15   : > { %p1661_p0 = pneg %p1859_p12 }
  0x17   : > { %p1662_p1 = pnand %p1661_p0, %p1660_p13 }
  0x19   : > { %p1663_p2 = pneg %p1662_p1 }
  0x1b   : > { %p1668_p4 = pnand %p1666_p3, %p1663_p2 }
  0x1d   : > { %1671 = shalt.err (!%p1668_p4)
}
  0x1e   : > { %s1672_s20 = scalar_lea.vmem %s204_s11, 2048  ;;  %p1680_p9 = scmp.lt.s32.totalorder %s204_s11, %s204_s11 }
  0x1f   : > { %p1673_p7 = scmp.ne.s32.totalorder %s204_s11, %s1672_s20  ;;  %p1681_p6 = scmp.lt.s32.totalorder %s1672_s20, %s1672_s20 }
  0x21   : > { %p1675_p8 = pnand %p1673_p7, %p1661_p0  ;;  %p1682_p5 = por %p1681_p6, %p1680_p9 }
  0x23   : > { %p1676_p11 = pneg %p1675_p8 }
  0x25   : > { %p1683_p10 = pnand %p1682_p5, %p1676_p11 }
  0x27   : > { %1686 = shalt.err (!%p1683_p10)
}
  0x28   : > { %s1756_s26 = smov 128   ;;  %s1757_s28 = smov 8  }
  0x29   : > { %1599 = dma.hbm_to_vmem [thread:$0]  (!%p1859_p12), %s2178_s4, 2048, %s204_s11, [#allocation3], %s1756_s26, %s1756_s26, %s1757_s28  }
  0x2a   : > { %p2188_p13 = scmp.ne.s32.totalorder %s2186_s9, 0 }
  0x2b   : > { %p2189_p1 = scmp.eq.s32.totalorder (!%p2188_p13), %s1823_s25, 0 }
  0x2c   : > { %229 = sbr.rel (%p2188_p13) target bundleno = 1437 (0x59d), region = 44 }
  0x33   : > { %1732 = dma.done.wait (%p2189_p1), [#allocation3], 2048   ;;  %p2190_p0 = pmov %p2189_p1 }
  0x34   : > { %p258_p5 = scmp.lt.s32.totalorder %s1823_s25, 1  ;;  %v1758_v0 = vmov 0   ;;  %v1759_v1 = vmov 2   ;;  %v1760_v2 = vmov 0.0|0.0   ;;  %v265_v4 = vld [vmem:[%s2175_s1] sm:$0xff]  ;;  %v266_v5 = vld [vmem:[%s2175_s1 + $0x8] sm:$0xff]  ;;  %v263_v31 = vlaneseq }
  0x35   : > { %1734 = vsyncadd (%p2190_p0), [#allocation3], 4294965248  ;;  %1650 = vset.pattern.permute.xlu0 %v1758_v0  ;;  %1652 = vset.pattern.permute.xlu1 %v1759_v1  ;;  %v1902_v6 = vpack.c.bf16 %v266_v5, %v265_v4  ;;  %v267_v7 = vld [vmem:[%s2175_s1 + $0x10] sm:$0xff]  ;;  %v268_v8 = vld [vmem:[%s2175_s1 + $0x18] sm:$0xff]  ;;  %vm1761_vm0 = vmmov 0   ;;  %v1762_v9 = vmov 0.0  }
  0x36   : > { %s259_s12 = scalar_select %p258_p5, %s1823_s25, 1  ;;  %1446 = vmatprep.subr.bf16.mxu0 %v1760_v2  ;;  %1470 = vmatprep.subr.bf16.mxu1 %v1760_v2  ;;  %v1915_v10 = vpack.c.bf16 %v268_v8, %v267_v7  ;;  %v269_v11 = vld [vmem:[%s2175_s1 + $0x20] sm:$0xff]  ;;  %v270_v12 = vld [vmem:[%s2175_s1 + $0x28] sm:$0xff]  ;;  %v1763_v13 = vmov 1   ;;  %v271_v15 = vld [vmem:[%s2175_s1 + $0x30] sm:$0xff]  ;;  %v1764_v30 = vmov 3  }
  0x37   : > { %1259 = vmatprep.mubr.msk.f32.mxu0 %vm1761_vm0, %v1762_v9  ;;  %1294 = vmatprep.mubr.msk.f32.mxu1 %vm1761_vm0, %v1762_v9  ;;  %v1928_v14 = vpack.c.bf16 %v270_v12, %v269_v11  ;;  %v272_v16 = vld [vmem:[%s2175_s1 + $0x38] sm:$0xff]  ;;  %v273_v18 = vld [vmem:[%s2175_s1 + $0x40] sm:$0xff]  ;;  %v274_v19 = vld [vmem:[%s2175_s1 + $0x48] sm:$0xff]  ;;  %v1998_v32 = vand.u32 127, %v263_v31  ;;  %v1765_v36 = vmov 1.0   ;;  %vm441_vm4 = vcmask 261120  }
  0x38   : > { %s1103_s9 = sshll.u32 %s259_s12, 3  ;;  %1448 = vmatpush3.bf16.msra.mxu0 %v1902_v6  ;;  %1472 = vmatpush3.bf16.msra.mxu1 %v1902_v6  ;;  %v1940_v17 = vpack.c.bf16 %v272_v16, %v271_v15  ;;  %v1952_v20 = vpack.c.bf16 %v274_v19, %v273_v18  ;;  %v275_v21 = vld [vmem:[%s2175_s1 + $0x50] sm:$0xff]  ;;  %v276_v22 = vld [vmem:[%s2175_s1 + $0x58] sm:$0xff]  ;;  %v277_v24 = vld [vmem:[%s2175_s1 + $0x60] sm:$0xff]  ;;  %s255_s29 = sand.u32 1, %s1745_s22  }
  0x39   : > { %s261_s14 = scalar_lea.vmem %s2174_s0, %s1103_s9  ;;  %1449 = vmatprep.subr.bf16.mxu0 %v1760_v2  ;;  %1473 = vmatprep.subr.bf16.mxu1 %v1760_v2  ;;  %v1964_v23 = vpack.c.bf16 %v276_v22, %v275_v21  ;;  %v278_v25 = vld [vmem:[%s2175_s1 + $0x68] sm:$0xff]  ;;  %v279_v27 = vld [vmem:[%s2175_s1 + $0x70] sm:$0xff]  ;;  %v280_v28 = vld [vmem:[%s2175_s1 + $0x78] sm:$0xff]  ;;  %vm998_vm6 = vcmp.lt.s32.totalorder %v1998_v32, 49  ;;  %s1102_s10 = sshll.u32 %s255_s29, 3 }
  0x3a   : > { %v1892_v3 = vld [vmem:[%s261_s14] sm:$0xff]  ;;  %v1976_v26 = vpack.c.bf16 %v278_v25, %v277_v24  ;;  %v1988_v29 = vpack.c.bf16 %v280_v28, %v279_v27  ;;  %v438_v35 = vld [vmem:[%s2176_s2 + $0x28] sm:$0xff]  ;;  %v439_v40 = vld [vmem:[%s2176_s2 + $0x30] sm:$0xff]  ;;  %s1119_s12 = sshll.u32 %s1823_s25, 7  ;;  %s257_s9 = scalar_lea.vmem [#allocation5], %s1102_s10 }
  0x3b   : > { %282 = vperm.xlu0 %1650, %v1892_v3   ;;  %589 = vperm.xlu1 %1652, %v1892_v3   ;;  %v437_v34 = vld [vmem:[%s2176_s2 + $0x20] sm:$0xff]  ;;  %v440_v41 = vld [vmem:[%s2176_s2 + $0x38] sm:$0xff]  ;;  %v358_v45 = vld [vmem:[%s2176_s2 + $0x8] sm:$0xff]  ;;  %s1025_s11 = sshll.u32 %s257_s9, 4  ;;  %s2132_s15 = scalar_lea.hbm %s2180_s6, %s1119_s12  ;;  %s2134_s11 = int_to_ptr.vmem [resolvable:$true] %s1025_s11 }
  0x3c   : > { %1451 = vmatpush3.bf16.msra.mxu0 %v1915_v10  ;;  %1475 = vmatpush3.bf16.msra.mxu1 %v1915_v10  ;;  %v1495_v37 = vpack.c.bf16 %v438_v35, %v437_v34  ;;  %v1498_v42 = vpack.c.bf16 %v440_v41, %v439_v40  ;;  %v357_v44 = vld [vmem:[%s2176_s2] sm:$0xff]  ;;  %v359_v48 = vld [vmem:[%s2176_s2 + $0x10] sm:$0xff]  ;;  %v360_v49 = vld [vmem:[%s2176_s2 + $0x18] sm:$0xff]  ;;  %s1012_s16 = scalar_lea.sflag [#allocation4], %s255_s29  ;;  %s1687_s17 = scalar_lea.vmem %s2134_s11, 128 }
  0x3d   : > { %1452 = vmatprep.subr.bf16.mxu0 %v1760_v2  ;;  %1476 = vmatprep.subr.bf16.mxu1 %v1760_v2  ;;  %v1501_v47 = vpack.c.bf16 %v358_v45, %v357_v44  ;;  %v1504_v52 = vpack.c.bf16 %v360_v49, %v359_v48  ;;  %v664_v53 = vld [vmem:[%s2176_s2 + $0x40] sm:$0xff]  ;;  %v665_v54 = vld [vmem:[%s2176_s2 + $0x48] sm:$0xff]  ;;  %v666_v56 = vld [vmem:[%s2176_s2 + $0x50] sm:$0xff]  ;;  %p1688_p6 = scmp.ne.s32.totalorder %s2134_s11, %s1687_s17  ;;  %p2191_p9 = scmp.ne.s32.totalorder %s2184_s7, 0 }
  0x3e   : > { %v1531_v55 = vpack.c.bf16 %v665_v54, %v664_v53  ;;  %v667_v57 = vld [vmem:[%s2176_s2 + $0x58] sm:$0xff]  ;;  %v818_v62 = vld [vmem:[%s2176_s2 + $0x60] sm:$0xff]  ;;  %v819_v63 = vld [vmem:[%s2176_s2 + $0x68] sm:$0xff]  ;;  %s1766_s25 = smov [#allocation5]  }
  0x3f   : > { %1651 = vset.pattern.permute.xlu0 %v1763_v13  ;;  %1653 = vset.pattern.permute.xlu1 %v1764_v30  ;;  %v1534_v58 = vpack.c.bf16 %v667_v57, %v666_v56  ;;  %v820_v0 = vld [vmem:[%s2176_s2 + $0x70] sm:$0xff]  ;;  %v1561_v1 = vpack.c.bf16 %v819_v63, %v818_v62  ;;  %v907_v7 = vld [vmem:[#allocation2 + $0x10] sm:$0xff]  ;;  %v910_v12 = vld [vmem:[#allocation2 + $0x28] sm:$0xff]  ;;  %p1689_p10 = pnand %p1688_p6, %p2191_p9  ;;  %s1691_s18 = sshll.u32 %s1766_s25, 4  ;;  %s1692_s18 = int_to_ptr.vmem [resolvable:$false] %s1691_s18 }
  0x40   : > { %362 = vperm.xlu0 %1651, %v1892_v3   ;;  %1454 = vmatpush3.bf16.msra.mxu0 %v1928_v14  ;;  %v905_v5 = vld [vmem:[#allocation2] sm:$0xff]  ;;  %v912_v15 = vld [vmem:[#allocation2 + $0x38] sm:$0xff]  ;;  %v914_v18 = vld [vmem:[#allocation2 + $0x48] sm:$0xff]  ;;  %s1693_s19 = scalar_lea.vmem %s1692_s18, 256  ;;  %p1694_p2 = scmp.lt.s32.totalorder %s2134_s11, %s1692_s18 }
  0x41   : > { %1478 = vmatpush3.bf16.msra.mxu1 %v1928_v14  ;;  %1455 = vmatprep.subr.bf16.mxu0 %v1760_v2  ;;  %v909_v11 = vld [vmem:[#allocation2 + $0x20] sm:$0xff]  ;;  %v916_v21 = vld [vmem:[#allocation2 + $0x58] sm:$0xff]  ;;  %v918_v35 = vld [vmem:[#allocation2 + $0x68] sm:$0xff]  ;;  %p1690_p12 = pneg %p1689_p10  ;;  %p1695_p3 = scmp.lt.s32.totalorder %s1693_s19, %s1687_s17 }
  0x42   : > { %1479 = vmatprep.subr.bf16.mxu1 %v1760_v2  ;;  %743 = vperm.xlu1 %1653, %v1892_v3   ;;  %v821_v3 = vld [vmem:[%s2176_s2 + $0x78] sm:$0xff]  ;;  %v1573_v13 = vpack.c.bf16 %v910_v12, %v909_v11  ;;  %v917_v34 = vld [vmem:[#allocation2 + $0x60] sm:$0xff]  ;;  %v1116_v41 = vld [vmem:[%s2177_s3] ss:$0 sm:$0xff] }
  0x43   : > { %v1564_v4 = vpack.c.bf16 %v821_v3, %v820_v0  ;;  %p1696_p4 = por %p1695_p3, %p1694_p2 }
  0x44   : > { %1457 = vmatpush3.bf16.msra.mxu0 %v1940_v17  ;;  %1654 = vset.pattern.permute.xlu0 %v1764_v30 }
  0x45   : > { %1481 = vmatpush3.bf16.msra.mxu1 %v1940_v17  ;;  %1458 = vmatprep.subr.bf16.mxu0 %v1760_v2  ;;  %p1697_p7 = pnand %p1696_p4, %p1690_p12 }
  0x46   : > { %1482 = vmatprep.subr.bf16.mxu1 %v1760_v2 }
  0x48   : > { %1460 = vmatpush3.bf16.msra.mxu0 %v1952_v20 }
  0x49   : > { %1484 = vmatpush3.bf16.msra.mxu1 %v1952_v20  ;;  %1461 = vmatprep.subr.bf16.mxu0 %v1760_v2 }
  0x4a   : > { %1485 = vmatprep.subr.bf16.mxu1 %v1760_v2 }
  0x4c   : > { %1463 = vmatpush3.bf16.msra.mxu0 %v1964_v23 }
  0x4d   : > { %1487 = vmatpush3.bf16.msra.mxu1 %v1964_v23  ;;  %1464 = vmatprep.subr.bf16.mxu0 %v1760_v2 }
  0x4e   : > { %1488 = vmatprep.subr.bf16.mxu1 %v1760_v2 }
  0x50   : > { %1466 = vmatpush3.bf16.msra.mxu0 %v1976_v26 }
  0x51   : > { %1490 = vmatpush3.bf16.msra.mxu1 %v1976_v26  ;;  %1467 = vmatprep.subr.bf16.mxu0 %v1760_v2 }
  0x52   : > { %1491 = vmatprep.subr.bf16.mxu1 %v1760_v2 }
  0x54   : > { %1469 = vmatpush3.bf16.msra.mxu0 %v1988_v29 }
  0x55   : > { %1493 = vmatpush3.bf16.msra.mxu1 %v1988_v29  ;;  %1506 = vmatprep.subr.bf16.mxu0 %v1760_v2 }
  0x56   : > { %1494 = vmatprep.subr.bf16.mxu1 %v1760_v2 }
  0xba   : > { %v283_v33 = vpop.permute.xlu0 %282  ;;  %v590_v39 = vpop.permute.xlu1 %589 }
  0xbb   : > { %vm284_vm1 = vcmp.eq.s32.totalorder %v283_v33, %v1998_v32  ;;  %vm591_vm3 = vcmp.eq.s32.totalorder %v590_v39, %v1998_v32 }
  0xbc   : > { %1260 = vmatmul.mubr.msk.f32.vlgmr.msra.gmra.mrb[0].mxu0 %vm284_vm1, %v1765_v36 }
  0xbd   : > { %1508 = vmatpush3.bf16.msra.mxu0 %v1902_v6  ;;  %1351 = vmatprep.mubr.msk.f32.mxu0 %vm1761_vm0, %v1762_v9 }
  0xbe   : > { %1509 = vmatprep.subr.bf16.mxu0 %v1760_v2 }
  0xbf   : > { %v363_v38 = vpop.permute.xlu0 %362 }
  0xc0   : > { %vm364_vm2 = vcmp.eq.s32.totalorder %v363_v38, %v1998_v32  ;;  %v920_v38 = vld [vmem:[#allocation2 + $0x78] sm:$0xff] }
  0xc1   : > { %1511 = vmatpush3.bf16.msra.mxu0 %v1915_v10  ;;  %1295 = vmatmul.mubr.msk.f32.vlgmr.msra.gmra.mrb[0].mxu1 %vm364_vm2, %v1765_v36  ;;  %v744_v61 = vpop.permute.xlu1 %743 }
  0xc2   : > { %1512 = vmatprep.subr.bf16.mxu0 %v1760_v2  ;;  %1496 = vmatpush3.bf16.msra.mxu1 %v1495_v37  ;;  %vm745_vm5 = vcmp.eq.s32.totalorder %v744_v61, %v1998_v32  ;;  %v919_v37 = vld [vmem:[#allocation2 + $0x70] sm:$0xff] }
  0xc3   : > { %1497 = vmatprep.subr.bf16.mxu1 %v1760_v2  ;;  %1305 = vmatprep.mubr.msk.f32.mxu1 %vm1761_vm0, %v1762_v9  ;;  %v1588_v39 = vpack.c.bf16 %v920_v38, %v919_v37 }
  0xc5   : > { %1514 = vmatpush3.bf16.msra.mxu0 %v1928_v14 }
  0xc6   : > { %1515 = vmatprep.subr.bf16.mxu0 %v1760_v2  ;;  %1499 = vmatpush3.bf16.msra.mxu1 %v1498_v42 }
  0xc7   : > { %1500 = vmatprep.subr.bf16.mxu1 %v1760_v2 }
  0xc9   : > { %1517 = vmatpush3.bf16.msra.mxu0 %v1940_v17 }
  0xca   : > { %1518 = vmatprep.subr.bf16.mxu0 %v1760_v2 }
  0xcd   : > { %1520 = vmatpush3.bf16.msra.mxu0 %v1952_v20 }
  0xce   : > { %1521 = vmatprep.subr.bf16.mxu0 %v1760_v2 }
  0xd1   : > { %1523 = vmatpush3.bf16.msra.mxu0 %v1964_v23 }
  0xd2   : > { %1524 = vmatprep.subr.bf16.mxu0 %v1760_v2 }
  0xd5   : > { %1526 = vmatpush3.bf16.msra.mxu0 %v1976_v26 }
  0xd6   : > { %1527 = vmatprep.subr.bf16.mxu0 %v1760_v2 }
  0xd9   : > { %1529 = vmatpush3.bf16.msra.mxu0 %v1988_v29 }
  0xda   : > { %1566 = vmatprep.subr.bf16.mxu0 %v1760_v2 }
  0xdc   : > { %1352 = vmatmul.mubr.msk.f32.vlgmr.msra.gmra.mrb[2].mxu0 %vm591_vm3, %v1765_v36 }
  0xdd   : > { %1443 = vmatprep.mubr.msk.f32.mxu0 %vm1761_vm0, %v1762_v9 }
 0x18f   : > { %v353_v43 = vpop.f32.mrb[0].mxu0 }
 0x190   : > { %v1261_v46 = vpop.f32.mrb[1].mxu0 }
 0x191   : > { %v1117_v46 = vld [vmem:[%s2179_s5] ss:$0 sm:$0xff] }
 0x194   : > { %v433_v50 = vpop.f32.mrb[0].mxu1 }
 0x195   : > { %1306 = vmatmul.mubr.msk.f32.vlgmr.msra.gmra.mrb[2].mxu1 %vm441_vm4, %v433_v50  ;;  %v1296_v51 = vpop.f32.mrb[1].mxu1 }
 0x196   : > { %1502 = vmatpush3.bf16.msra.mxu1 %v1501_v47  ;;  %1316 = vmatprep.mubr.msk.f32.mxu1 %vm1761_vm0, %v1762_v9 }
 0x197   : > { %1503 = vmatprep.subr.bf16.mxu1 %v1760_v2 }
 0x19a   : > { %1505 = vmatpush3.bf16.msra.mxu1 %v1504_v52 }
 0x19b   : > { %1530 = vmatprep.subr.bf16.mxu1 %v1760_v2 }
 0x19d   : > { %1317 = vmatmul.mubr.msk.f32.vlgmr.msra.gmra.mrb[4].mxu1 %vm441_vm4, %v353_v43 }
 0x19e   : > { %1532 = vmatpush3.bf16.msra.mxu1 %v1531_v55  ;;  %1362 = vmatprep.mubr.msk.f32.mxu1 %vm1761_vm0, %v1762_v9 }
 0x19f   : > { %1533 = vmatprep.subr.bf16.mxu1 %v1760_v2 }
 0x1a2   : > { %1535 = vmatpush3.bf16.msra.mxu1 %v1534_v58 }
 0x1a3   : > { %1536 = vmatprep.subr.bf16.mxu1 %v1760_v2 }
 0x1af   : > { %v660_v59 = vpop.f32.mrb[2].mxu0 }
 0x1b0   : > { %v1353_v60 = vpop.f32.mrb[3].mxu0  ;;  %1363 = vmatmul.mubr.msk.f32.vlgmr.msra.gmra.mrb[6].mxu1 %vm441_vm4, %v660_v59 }
 0x1b1   : > { %1538 = vmatpush3.bf16.msra.mxu1 %v1902_v6  ;;  %1397 = vmatprep.mubr.msk.f32.mxu1 %vm1761_vm0, %v1762_v9  ;;  %v906_v6 = vld [vmem:[#allocation2 + $0x8] sm:$0xff] }
 0x1b2   : > { %1539 = vmatprep.subr.bf16.mxu1 %v1760_v2  ;;  %v1567_v8 = vpack.c.bf16 %v906_v6, %v905_v5 }
 0x1b4   : > { %1568 = vmatpush3.bf16.msra.mxu0 %v1567_v8 }
 0x1b5   : > { %1541 = vmatpush3.bf16.msra.mxu1 %v1915_v10  ;;  %1569 = vmatprep.subr.bf16.mxu0 %v1760_v2 }
 0x1b6   : > { %1542 = vmatprep.subr.bf16.mxu1 %v1760_v2 }
 0x1b9   : > { %1544 = vmatpush3.bf16.msra.mxu1 %v1928_v14  ;;  %v911_v14 = vld [vmem:[#allocation2 + $0x30] sm:$0xff] }
 0x1ba   : > { %1545 = vmatprep.subr.bf16.mxu1 %v1760_v2  ;;  %v1576_v16 = vpack.c.bf16 %v912_v15, %v911_v14 }
 0x1bd   : > { %1547 = vmatpush3.bf16.msra.mxu1 %v1940_v17  ;;  %v913_v17 = vld [vmem:[#allocation2 + $0x40] sm:$0xff] }
 0x1be   : > { %1548 = vmatprep.subr.bf16.mxu1 %v1760_v2  ;;  %v1579_v19 = vpack.c.bf16 %v914_v18, %v913_v17 }
 0x1c1   : > { %1550 = vmatpush3.bf16.msra.mxu1 %v1952_v20  ;;  %v915_v20 = vld [vmem:[#allocation2 + $0x50] sm:$0xff] }
 0x1c2   : > { %1551 = vmatprep.subr.bf16.mxu1 %v1760_v2  ;;  %v1582_v22 = vpack.c.bf16 %v916_v21, %v915_v20 }
 0x1c5   : > { %1553 = vmatpush3.bf16.msra.mxu1 %v1964_v23 }
 0x1c6   : > { %1554 = vmatprep.subr.bf16.mxu1 %v1760_v2 }
 0x1c9   : > { %1556 = vmatpush3.bf16.msra.mxu1 %v1976_v26 }
 0x1ca   : > { %1557 = vmatprep.subr.bf16.mxu1 %v1760_v2 }
 0x1cd   : > { %1559 = vmatpush3.bf16.msra.mxu1 %v1988_v29 }
 0x1ce   : > { %1560 = vmatprep.subr.bf16.mxu1 %v1760_v2 }
 0x1d0   : > { %1398 = vmatmul.mubr.msk.f32.vlgmr.msra.gmra.mrb[8].mxu1 %vm745_vm5, %v1765_v36  ;;  %v1585_v36 = vpack.c.bf16 %v918_v35, %v917_v34 }
 0x1d1   : > { %1408 = vmatprep.mubr.msk.f32.mxu1 %vm1761_vm0, %v1762_v9  ;;  %1562 = vmatpush3.bf16.msra.mxu1 %v1561_v1  ;;  %v908_v9 = vld [vmem:[#allocation2 + $0x18] sm:$0xff] }
 0x1d2   : > { %1563 = vmatprep.subr.bf16.mxu1 %v1760_v2  ;;  %v1570_v10 = vpack.c.bf16 %v908_v9, %v907_v7 }
 0x1d4   : > { %1571 = vmatpush3.bf16.msra.mxu0 %v1570_v10 }
 0x1d5   : > { %1565 = vmatpush3.bf16.msra.mxu1 %v1564_v4  ;;  %1572 = vmatprep.subr.bf16.mxu0 %v1760_v2 }
 0x1d8   : > { %1574 = vmatpush3.bf16.msra.mxu0 %v1573_v13 }
 0x1d9   : > { %1575 = vmatprep.subr.bf16.mxu0 %v1760_v2 }
 0x1dc   : > { %1577 = vmatpush3.bf16.msra.mxu0 %v1576_v16 }
 0x1dd   : > { %1578 = vmatprep.subr.bf16.mxu0 %v1760_v2 }
 0x1e0   : > { %1580 = vmatpush3.bf16.msra.mxu0 %v1579_v19 }
 0x1e1   : > { %1581 = vmatprep.subr.bf16.mxu0 %v1760_v2 }
 0x1e4   : > { %1583 = vmatpush3.bf16.msra.mxu0 %v1582_v22 }
 0x1e5   : > { %1584 = vmatprep.subr.bf16.mxu0 %v1760_v2 }
 0x1e8   : > { %1586 = vmatpush3.bf16.msra.mxu0 %v1585_v36 }
 0x1e9   : > { %1587 = vmatprep.subr.bf16.mxu0 %v1760_v2 }
 0x1ec   : > { %1589 = vmatpush3.bf16.msra.mxu0 %v1588_v39 }
 0x268   : > { %v511_v23 = vpop.f32.mrb[2].mxu1 }
 0x269   : > { %v1307_v24 = vpop.f32.mrb[3].mxu1 }
 0x270   : > { %v584_v25 = vpop.f32.mrb[4].mxu1 }
 0x271   : > { %v585_v26 = vadd.f32 %v584_v25, %v511_v23  ;;  %v1318_v27 = vpop.f32.mrb[5].mxu1 }
 0x283   : > { %v737_v28 = vpop.f32.mrb[6].mxu1 }
 0x284   : > { %v741_v29 = vadd.f32 %v737_v28, %v585_v26  ;;  %v1364_v30 = vpop.f32.mrb[7].mxu1 }
 0x2a3   : > { %v814_v31 = vpop.f32.mrb[8].mxu1 }
 0x2a4   : > { %v1399_v33 = vpop.f32.mrb[9].mxu1  ;;  %1409 = vmatmul.mubr.msk.f32.vlgmr.msra.gmra.mrb[10].mxu1 %vm441_vm4, %v814_v31 }
 0x377   : > { %v891_v40 = vpop.f32.mrb[10].mxu1 }
 0x378   : > { %v895_v42 = vadd.f32 %v891_v40, %v741_v29  ;;  %v1410_v43 = vpop.f32.mrb[11].mxu1 }
 0x37a   : > { %v903_v44 = vadd.f32 %v1116_v41, %v895_v42 }
 0x37c   : > { %v904_v45 = vmax.f32 %v903_v44, 0.0 }
 0x37e   : > { %1444 = vmatmul.mubr.f32.vlgmr.msra.gmra.mrb[4].mxu0 %v904_v45 }
 0x451   : > { %v994_v2 = vpop.f32.mrb[4].mxu0 }
 0x452   : > { %v995_v47 = vadd.f32 %v1117_v46, %v994_v2  ;;  %v1445_v48 = vpop.f32.mrb[5].mxu0 }
 0x454   : > { %v999_v49 = vsel %vm998_vm6, %v995_v47, -1e+30 }
 0x455   : > { %1000 = vmax.xlane.f32.xlu1 %v999_v49 }
 0x4e2   : > { %v1001_v50 = vpop.xlane.xlu1 %1000 }
 0x4e3   : > { %v1002_v51 = vsub.f32 %v999_v49, %v1001_v50 }
 0x4e5   : > { %v1003_v52 = vmul.f32 1.442695, %v1002_v51 }
 0x4e7   : > { %1655 = vpow2.f32 %v1003_v52 }
 0x4f1   : > { %v1656_v53 = vpop.eup %1655 }
 0x4f2   : > { %1005 = vadd.xlane.f32.xlu0 %v1656_v53 }
 0x57f   : > { %v1006_v54 = vpop.xlane.xlu0 %1005 }
 0x580   : > { %1657 = vlog2.f32 %v1006_v54 }
 0x58a   : > { %v1658_v55 = vpop.eup %1657 }
 0x58b   : > { %v1008_v32 = vmul.f32 0.6931472, %v1658_v55 }
 0x58d   : > { %v1009_v56 = vsub.f32 %v1002_v51, %v1008_v32 }
 0x58f   : > { %1010 = vst [vmem:[%s257_s9] sm:$0xff] %v1009_v56 }
 0x590   : > { %1700 = shalt.err (!%p1697_p7)
}
 0x591   : > { %s1701_s20 = scalar_lea.hbm %s2132_s15, 128  ;;  %s1705_s29 = scalar_lea.hbm %s2180_s6, 256 }
 0x592   : > { %p1702_p8 = scmp.ne.s32.totalorder %s2132_s15, %s1701_s20  ;;  %p1706_p1 = scmp.lt.u32.totalorder %s2132_s15, %s2180_s6 }
 0x593   : > { %p1707_p0 = scmp.lt.u32.totalorder %s1705_s29, %s1701_s20  ;;  %p1709_p6 = scmp.lt.u32.totalorder %s1701_s20, %s2132_s15 }
 0x594   : > { %p1703_p11 = pnand %p1702_p8, %p2191_p9 }
 0x595   : > { %p1708_p5 = por %p1707_p0, %p1706_p1 }
 0x596   : > { %p1704_p13 = pneg %p1703_p11 }
 0x597   : > { %p1710_p10 = por %p1709_p6, %p1708_p5 }
 0x599   : > { %p1711_p12 = pnand %p1710_p10, %p1704_p13 }
 0x59b   : > { %1714 = shalt.err (!%p1711_p12)
}
 0x59c   : > { %1594 = dma.vmem_to_hbm [thread:$0]  (%p2191_p9), %s2134_s11, 128, %s2132_s15, %s1012_s16  }
 0x59d PF: > { %p1606_p2 = scmp.ge.s32.totalorder %s1753_s24, 2  ;;  %s1037_s9 = sand.u32 1, %s1741_s21  }
 0x59e   : > { %p2192_p3 = scmp.ne.s32.totalorder %s2185_s8, 0  ;;  %s1038_s13 = scalar_lea.sflag [#allocation4], %s1037_s9 }
 0x5a0   : > { %p1601_p4 = pnand %p1606_p2, %p2192_p3 }
 0x5a2   : > { %1736 = dma.done.wait (!%p1601_p4), %s1038_s13, 128  }
 0x5a3   : > { %1738 = vsyncadd (!%p1601_p4), %s1038_s13, 4294967168  ;;  %p17_p7 = scmp.ge.s32.totalorder %s1827_s27, 4   ;;  %s2193_s21 = smov %s1745_s22 }
 0x5a4   : > { %s2194_s22 = smov %s1749_s23  ;;  %s2195_s23 = smov %s1838_s30 }
 0x5a5   : > { %s2196_s24 = smov %s1827_s27  ;;  %19 = sbr.rel (!%p17_p7) target bundleno = 4 (0x4), region = 84 }
 0x5ac   :  { %1043 = vsyncpa [#allocation3], 1 }
 0x5ad   :  { %1045 = vsyncpa [#allocation3 + $0x1], 1 }
 0x5ae   :  { %1046 = vsyncpa [#allocation4], 1 }
 0x5af   :  { %1048 = vsyncpa [#allocation4 + $0x1], 1 }

</bundles_post_ra>
